<compile_context>
chip_gen: v7x
topology: tpu7x:2x2x1
jax: 0.10.0
libtpu: 0.0.40
codegen_flags: <defaults>
</compile_context>

<pallas_src>
import functools
import math

import jax
import jax.numpy as jnp
from jax.experimental import pallas as pl
from jax.experimental.pallas import tpu as pltpu

_MiB = 1024 * 1024


def _round_up(n, m):
    return ((n + m - 1) // m) * m


def _cdiv(a, b):
    return -(-a // b)


# ----------------------------------------------------------------------------
# One-time hardware / feature detection (cached at module level).
# ----------------------------------------------------------------------------
_DEVICE_KIND = None
_VMEM_BYTES = None
_BUFFERED_OK = None


def _device_kind():
    global _DEVICE_KIND
    if _DEVICE_KIND is None:
        try:
            _DEVICE_KIND = jax.devices()[0].device_kind.lower()
        except Exception:
            _DEVICE_KIND = ""
    return _DEVICE_KIND


def _num_tensorcores():
    # v7x has 2 TensorCores per chip; v5e/v6e have 1.
    return 2 if "v7" in _device_kind() else 1


def _tpu_vmem_bytes():
    global _VMEM_BYTES
    if _VMEM_BYTES is not None:
        return _VMEM_BYTES
    vmem = None
    try:
        info = pltpu.get_tpu_info()
        for attr in ("vmem_capacity_bytes", "vmem_bytes", "vmem_size_bytes"):
            v = getattr(info, attr, None)
            if isinstance(v, int) and v > 0:
                vmem = v
                break
    except Exception:
        vmem = None
    if vmem is None:
        kind = _device_kind()
        if ("v5" in kind) or ("v6" in kind):
            vmem = 128 * _MiB
        else:
            vmem = 64 * _MiB  # v7x or unknown -> conservative
    _VMEM_BYTES = vmem
    return vmem


def _buffered_supported():
    """Probe once whether pipeline_mode=pl.Buffered(1) compiles on this JAX."""
    global _BUFFERED_OK
    if _BUFFERED_OK is not None:
        return _BUFFERED_OK
    try:
        spec = pl.BlockSpec((8, 128), lambda i: (0, 0), pipeline_mode=pl.Buffered(1))

        def _probe_kernel(a_ref, o_ref):
            o_ref[...] = a_ref[...] * 2.0

        probe = pl.pallas_call(
            _probe_kernel,
            out_shape=jax.ShapeDtypeStruct((8, 128), jnp.float32),
            grid_spec=pltpu.PrefetchScalarGridSpec(
                num_scalar_prefetch=0,
                grid=(1,),
                in_specs=[spec],
                out_specs=pl.BlockSpec((8, 128), lambda i: (0, 0))),
        )
        jax.jit(probe).lower(jnp.zeros((8, 128), jnp.float32)).compile()
        _BUFFERED_OK = True
    except Exception:
        _BUFFERED_OK = False
    return _BUFFERED_OK


# ----------------------------------------------------------------------------
# Kernel
# ----------------------------------------------------------------------------
def _pick_n_sub(tm):
    """Row sub-chunks inside the kernel body (MXU/EUP overlap)."""
    for n in (4, 2):
        if tm % (8 * n) == 0 and tm // n >= 64:
            return n
    return 1


def _gating_kernel(x_ref, y_ref, wcat_ref, ucat_ref, ug_ref, bcat_ref, o_ref,
                   *, d, n_sub):
    """One (tm, d) row tile; d = padded feature width (multiple of 128)."""
    tm = x_ref.shape[0]
    sm = tm // n_sub
    cdt = wcat_ref.dtype          # MXU operand dtype (bf16 on the fast path)

    wcat = wcat_ref[...]          # (d, 3d)
    ucat = ucat_ref[...]          # (d, 2d)
    ug = ug_ref[...]              # (d, d)
    bcat = bcat_ref[...]          # (1, 3d) f32

    # Static sub-chunk loop: independent chains let the LLO scheduler overlap
    # chunk i+1's MXU matmuls with chunk i's sigmoid/tanh (EUP) and blend (VPU).
    for c in range(n_sub):
        rs = pl.ds(c * sm, sm)
        xr = x_ref[rs, :]                       # (sm, d) act dtype
        yr = y_ref[rs, :]
        x = xr.astype(jnp.float32)              # gate math / blend in f32
        xm = xr.astype(cdt)                     # MXU operands
        ym = yr.astype(cdt)

        # y @ [Wr|Wz|Wg] + [b_r|b_z|b_h]  -> (sm, 3d) f32
        yw = jnp.dot(ym, wcat, preferred_element_type=jnp.float32) + bcat
        # x @ [Ur|Uz] -> (sm, 2d) f32
        xu = jnp.dot(xm, ucat, preferred_element_type=jnp.float32)

        r = jax.nn.sigmoid(yw[:, :d] + xu[:, :d])
        z = jax.nn.sigmoid(yw[:, d:2 * d] + xu[:, d:])
        h = jnp.tanh(yw[:, 2 * d:]
                     + jnp.dot((r * x).astype(cdt), ug,
                               preferred_element_type=jnp.float32))

        o_ref[rs, :] = ((1.0 - z) * x + z * h).astype(o_ref.dtype)


def _estimate_vmem_bytes(tm, dp, w_bytes, act_bytes, out_bytes, weight_bufs):
    n_sub = _pick_n_sub(tm)
    sm = tm // n_sub
    weights = weight_bufs * (6 * dp * dp * w_bytes + 3 * dp * 4)
    acts = 2 * tm * dp * (2 * act_bytes + out_bytes)   # x, y, out double-buffered
    interm = 8 * sm * dp * 4                           # yw/xu/r/z/h temps (f32)
    return weights + acts + interm


def _build_call(n_steps, tm, mp, dp, out_dtype, vmem_limit, weight_buffer_count,
                n_sub):
    row_spec = pl.BlockSpec((tm, dp), lambda i: (i, 0))

    def const_spec(shape):
        if weight_buffer_count is None:
            return pl.BlockSpec(shape, lambda i: (0, 0))
        return pl.BlockSpec(shape, lambda i: (0, 0),
                            pipeline_mode=pl.Buffered(weight_buffer_count))

    return pl.pallas_call(
        functools.partial(_gating_kernel, d=dp, n_sub=n_sub),
        out_shape=jax.ShapeDtypeStruct((mp, dp), out_dtype),
        grid_spec=pltpu.PrefetchScalarGridSpec(
            num_scalar_prefetch=0,
            grid=(n_steps,),
            in_specs=[row_spec, row_spec,
                      const_spec((dp, 3 * dp)),     # [Wr|Wz|Wg]
                      const_spec((dp, 2 * dp)),     # [Ur|Uz]
                      const_spec((dp, dp)),         # Ug
                      const_spec((1, 3 * dp))],     # fused biases (f32)
            out_specs=row_spec,
        ),
        compiler_params=pltpu.CompilerParams(
            dimension_semantics=("parallel",),
            vmem_limit_bytes=vmem_limit),
    )


# ----------------------------------------------------------------------------
# Host-side packing (do ONCE per set of weights) and the per-call forward.
# ----------------------------------------------------------------------------
def pack_gating_params(params, bg, *, matmul_dtype=jnp.bfloat16):
    """Pre-fuse / pad / transpose the PyTorch-style Linear weights. Cache this."""
    D = params["Wr"].shape[0]
    Dp = _round_up(max(D, 128), 128)

    def pad_w(name):                      # (out,in) -> (in,out), zero-pad
        w = params[name].astype(jnp.float32).T
        return jnp.pad(w, ((0, Dp - D), (0, Dp - D)))

    def pad_b(v):
        return jnp.pad(v.astype(jnp.float32), (0, Dp - D))

    Wcat = jnp.concatenate([pad_w("Wr"), pad_w("Wz"), pad_w("Wg")],
                           axis=1).astype(matmul_dtype)            # (Dp, 3Dp)
    Ucat = jnp.concatenate([pad_w("Ur"), pad_w("Uz")],
                           axis=1).astype(matmul_dtype)            # (Dp, 2Dp)
    Ug = pad_w("Ug").astype(matmul_dtype)                          # (Dp, Dp)

    b_r = pad_b(params["br"] + params["bur"])
    b_z = pad_b(params["bz"] + params["buz"] - bg)
    b_h = pad_b(params["bgg"] + params["bug"])
    bcat = jnp.concatenate([b_r, b_z, b_h]).reshape(1, 3 * Dp)     # f32

    return {"Wcat": Wcat, "Ucat": Ucat, "Ug": Ug, "bcat": bcat,
            "d": D, "d_pad": Dp}


def gating_forward(x, y, packed, *, tm=512, act_dtype=jnp.bfloat16,
                   out_dtype=jnp.float32):
    """x, y: (batch, seq, D).  Jit-friendly: no host syncs, no runtime fallback."""
    B, T, D = x.shape
    assert D == packed["d"], "packed params were built for a different d_input"
    Dp = packed["d_pad"]
    M = B * T

    w_bytes = jnp.dtype(packed["Wcat"].dtype).itemsize
    act_bytes = jnp.dtype(act_dtype).itemsize
    out_bytes = jnp.dtype(out_dtype).itemsize

    vmem_cap = _tpu_vmem_bytes()
    headroom = 8 * _MiB
    budget = min(int(0.72 * vmem_cap), vmem_cap - headroom)

    weight_bufs = 1 if _buffered_supported() else 2
    est = functools.partial(_estimate_vmem_bytes, dp=Dp, w_bytes=w_bytes,
                            act_bytes=act_bytes, out_bytes=out_bytes,
                            weight_bufs=weight_bufs)

    # ---- row-tile sizing --------------------------------------------------
    n_tc = _num_tensorcores()
    min_steps = 2 * n_tc if M >= 8 * 2 * n_tc else 1   # 4 on v7x, 2 on v5e/v6e
    tm = min(tm, _round_up(M, 8))
    if min_steps > 1:
        tm = min(tm, _round_up(_cdiv(M, min_steps), 8))

    if est(8) > budget:
        # Resident weights alone exceed the comfortable budget; use (almost)
        # all VMEM.  TODO(synk): column-/K-tile the weights for huge D on v7x.
        budget = vmem_cap - headroom
    while tm > 8 and est(tm) > budget:
        tm = max(8, (tm // 2) // 8 * 8)

    n_steps = _cdiv(M, tm)
    if n_tc == 2 and n_steps > 1 and n_steps % 2 == 1:
        n_steps += 1                       # even split across v7x's two TCs
    # Rebalance tm to minimize M-padding waste at this step count.
    tm = _round_up(_cdiv(M, n_steps), 8)
    Mp = n_steps * tm
    n_sub = _pick_n_sub(tm)

    vmem_limit = int(min(max(int(1.25 * est(tm)), 32 * _MiB),
                         vmem_cap - headroom))

    # ---- activation prep (cast to act dtype; pad only if needed) ----------
    def prep(a):
        a2 = a.reshape(M, D)
        if a2.dtype != act_dtype:
            a2 = a2.astype(act_dtype)
        if Mp != M or Dp != D:
            a2 = jnp.pad(a2, ((0, Mp - M), (0, Dp - D)))
        return a2

    call = _build_call(n_steps, tm, Mp, Dp, out_dtype, vmem_limit,
                       1 if weight_bufs == 1 else None, n_sub)
    out = call(prep(x), prep(y),
               packed["Wcat"], packed["Ucat"], packed["Ug"], packed["bcat"])
    if Mp != M or Dp != D:
        out = out[:M, :D]
    return out.reshape(B, T, D)


def gating_mechanism(x, y, params, bg, *, tm=512, matmul_dtype=jnp.bfloat16,
                     act_dtype=None, out_dtype=jnp.float32):
    """One-shot convenience. For repeated calls, cache pack_gating_params()."""
    if act_dtype is None:
        act_dtype = matmul_dtype
    packed = pack_gating_params(params, bg, matmul_dtype=matmul_dtype)
    return gating_forward(x, y, packed, tm=tm, act_dtype=act_dtype,
                          out_dtype=out_dtype)


# ----------------------------------------------------------------------------
# Reference + self-test
# ----------------------------------------------------------------------------
def _reference(x, y, params, bg):
    def lin(a, w, b):
        return a @ w.T + b
    r = jax.nn.sigmoid(lin(y, params["Wr"], params["br"]) + lin(x, params["Ur"], params["bur"]))
    z = jax.nn.sigmoid(lin(y, params["Wz"], params["bz"]) + lin(x, params["Uz"], params["buz"]) - bg)
    h = jnp.tanh(lin(y, params["Wg"], params["bgg"]) + lin(r * x, params["Ug"], params["bug"]))
    return (1.0 - z) * x + z * h


if __name__ == "__main__":
    B, T, D = 2, 8, 32
    bg = 0.1

    key = jax.random.PRNGKey(0)
    keys = jax.random.split(key, 16)
    bound = 1.0 / math.sqrt(D)

    names_w = ["Wr", "Ur", "Wz", "Uz", "Wg", "Ug"]
    names_b = ["br", "bur", "bz", "buz", "bgg", "bug"]
    params = {}
    for i, n in enumerate(names_w):
        params[n] = jax.random.uniform(keys[i], (D, D), jnp.float32, -bound, bound)
    for i, n in enumerate(names_b):
        params[n] = jax.random.uniform(keys[6 + i], (D,), jnp.float32, -bound, bound)

    x = jax.random.normal(keys[12], (B, T, D), jnp.float32)
    y = jax.random.normal(keys[13], (B, T, D), jnp.float32)

    ref = _reference(x, y, params, bg)

    # Strict semantics check: f32 weights + f32 activations.
    packed_f32 = pack_gating_params(params, bg, matmul_dtype=jnp.float32)
    out_f32 = jax.block_until_ready(
        gating_forward(x, y, packed_f32, act_dtype=jnp.float32))
    assert out_f32.shape == (B, T, D)
    assert jnp.allclose(out_f32, ref, atol=1e-5, rtol=1e-5), "f32 mismatch vs reference"

    # Default fast path: bf16 weights + bf16 activations, f32 gate math / output.
    packed_bf16 = pack_gating_params(params, bg, matmul_dtype=jnp.bfloat16)
    out_bf16 = jax.block_until_ready(gating_forward(x, y, packed_bf16))
    assert out_bf16.shape == (B, T, D)
    assert jnp.allclose(out_bf16, ref, atol=1e-1, rtol=1e-1), "bf16 mismatch vs reference"

    print("KERNEL_OK")
</pallas_src>

<mosaic_0001>
module attributes {stable_mosaic.version = 11 : i64} {
  func.func @_gating_kernel(%arg0: i32, %arg1: memref<8x128xf32, #tpu.memory_space<vmem>>, %arg2: memref<8x128xf32, #tpu.memory_space<vmem>>, %arg3: memref<128x384xf32, #tpu.memory_space<vmem>>, %arg4: memref<128x256xf32, #tpu.memory_space<vmem>>, %arg5: memref<128x128xf32, #tpu.memory_space<vmem>>, %arg6: memref<1x384xf32, #tpu.memory_space<vmem>>, %arg7: memref<8x128xf32, #tpu.memory_space<vmem>>) attributes {dimension_semantics = [#tpu.dimension_semantics<parallel>], iteration_bounds = array<i64: 2>, scalar_prefetch = 0 : i64, scratch_operands = 0 : i64, tpu.core_type = #tpu.core_type<tc>, window_params = [{transform_indices = @transform_0, window_bounds = array<i64: 8, 128>}, {transform_indices = @transform_1, window_bounds = array<i64: 8, 128>}, {pipeline_mode = #tpu.pipeline_mode<synchronous>, transform_indices = @transform_2, window_bounds = array<i64: 128, 384>}, {pipeline_mode = #tpu.pipeline_mode<synchronous>, transform_indices = @transform_3, window_bounds = array<i64: 128, 256>}, {pipeline_mode = #tpu.pipeline_mode<synchronous>, transform_indices = @transform_4, window_bounds = array<i64: 128, 128>}, {pipeline_mode = #tpu.pipeline_mode<synchronous>, transform_indices = @transform_5, window_bounds = array<i64: 1, 384>}, {transform_indices = @transform_6, window_bounds = array<i64: 8, 128>}]} {
    %c0 = arith.constant 0 : index
    %c0_0 = arith.constant 0 : index
    %0 = vector.load %arg3[%c0, %c0_0] : memref<128x384xf32, #tpu.memory_space<vmem>>, vector<128x384xf32>
    %c0_1 = arith.constant 0 : index
    %c0_2 = arith.constant 0 : index
    %1 = vector.load %arg4[%c0_1, %c0_2] : memref<128x256xf32, #tpu.memory_space<vmem>>, vector<128x256xf32>
    %c0_3 = arith.constant 0 : index
    %c0_4 = arith.constant 0 : index
    %2 = vector.load %arg5[%c0_3, %c0_4] : memref<128x128xf32, #tpu.memory_space<vmem>>, vector<128x128xf32>
    %c0_5 = arith.constant 0 : index
    %c0_6 = arith.constant 0 : index
    %3 = vector.load %arg6[%c0_5, %c0_6] : memref<1x384xf32, #tpu.memory_space<vmem>>, vector<1x384xf32>
    %c0_7 = arith.constant 0 : index
    %c0_8 = arith.constant 0 : index
    %4 = vector.load %arg1[%c0_7, %c0_8] : memref<8x128xf32, #tpu.memory_space<vmem>>, vector<8x128xf32>
    %c0_9 = arith.constant 0 : index
    %c0_10 = arith.constant 0 : index
    %5 = vector.load %arg2[%c0_9, %c0_10] : memref<8x128xf32, #tpu.memory_space<vmem>>, vector<8x128xf32>
    %cst = arith.constant dense<0.000000e+00> : vector<8x384xf32>
    %6 = tpu.matmul %5, %0, %cst {dimension_numbers = #tpu.dot_dimension_numbers<[1], [0], [0], [1], [0, 0, 1, 1], [], []>} : vector<8x128xf32>, vector<128x384xf32>, vector<8x384xf32> -> vector<8x384xf32>
    %7 = vector.broadcast %3 : vector<1x384xf32> to vector<8x384xf32>
    %8 = arith.addf %6, %7 : vector<8x384xf32>
    %cst_11 = arith.constant dense<0.000000e+00> : vector<8x256xf32>
    %9 = tpu.matmul %4, %1, %cst_11 {dimension_numbers = #tpu.dot_dimension_numbers<[1], [0], [0], [1], [0, 0, 1, 1], [], []>} : vector<8x128xf32>, vector<128x256xf32>, vector<8x256xf32> -> vector<8x256xf32>
    %10 = vector.extract_strided_slice %8 {offsets = [0, 0], sizes = [8, 128], strides = [1, 1]} : vector<8x384xf32> to vector<8x128xf32>
    %11 = vector.extract_strided_slice %9 {offsets = [0, 0], sizes = [8, 128], strides = [1, 1]} : vector<8x256xf32> to vector<8x128xf32>
    %12 = arith.addf %10, %11 : vector<8x128xf32>
    %13 = arith.negf %12 : vector<8x128xf32>
    %14 = math.exp %13 : vector<8x128xf32>
    %cst_12 = arith.constant 1.000000e+00 : f32
    %15 = vector.broadcast %cst_12 : f32 to vector<8x128xf32>
    %16 = arith.addf %15, %14 : vector<8x128xf32>
    %17 = arith.divf %15, %16 : vector<8x128xf32>
    %18 = vector.extract_strided_slice %8 {offsets = [0, 128], sizes = [8, 128], strides = [1, 1]} : vector<8x384xf32> to vector<8x128xf32>
    %19 = vector.extract_strided_slice %9 {offsets = [0, 128], sizes = [8, 128], strides = [1, 1]} : vector<8x256xf32> to vector<8x128xf32>
    %20 = arith.addf %18, %19 : vector<8x128xf32>
    %21 = arith.negf %20 : vector<8x128xf32>
    %22 = math.exp %21 : vector<8x128xf32>
    %cst_13 = arith.constant 1.000000e+00 : f32
    %23 = vector.broadcast %cst_13 : f32 to vector<8x128xf32>
    %24 = arith.addf %23, %22 : vector<8x128xf32>
    %25 = arith.divf %23, %24 : vector<8x128xf32>
    %26 = vector.extract_strided_slice %8 {offsets = [0, 256], sizes = [8, 128], strides = [1, 1]} : vector<8x384xf32> to vector<8x128xf32>
    %27 = arith.mulf %17, %4 : vector<8x128xf32>
    %cst_14 = arith.constant dense<0.000000e+00> : vector<8x128xf32>
    %28 = tpu.matmul %27, %2, %cst_14 {dimension_numbers = #tpu.dot_dimension_numbers<[1], [0], [0], [1], [0, 0, 1, 1], [], []>} : vector<8x128xf32>, vector<128x128xf32>, vector<8x128xf32> -> vector<8x128xf32>
    %29 = arith.addf %26, %28 : vector<8x128xf32>
    %30 = math.tanh %29 : vector<8x128xf32>
    %cst_15 = arith.constant 1.000000e+00 : f32
    %31 = vector.broadcast %cst_15 : f32 to vector<8x128xf32>
    %32 = arith.subf %31, %25 : vector<8x128xf32>
    %33 = arith.mulf %32, %4 : vector<8x128xf32>
    %34 = arith.mulf %25, %30 : vector<8x128xf32>
    %35 = arith.addf %33, %34 : vector<8x128xf32>
    %c0_16 = arith.constant 0 : index
    %c0_17 = arith.constant 0 : index
    %36 = vector.load %arg7[%c0_16, %c0_17] : memref<8x128xf32, #tpu.memory_space<vmem>>, vector<8x128xf32>
    tpu.vector_store %arg7[%c0_16, %c0_17], %35 {strides = array<i32>} : memref<8x128xf32, #tpu.memory_space<vmem>>, vector<8x128xf32>,
    return
  }
  func.func @transform_0(%arg0: i32) -> (i32, i32) {
    %c0_i32 = arith.constant 0 : i32
    %c0_i32_0 = arith.constant 0 : i32
    return %arg0, %c0_i32 : i32, i32
  }
  func.func @transform_1(%arg0: i32) -> (i32, i32) {
    %c0_i32 = arith.constant 0 : i32
    %c0_i32_0 = arith.constant 0 : i32
    return %arg0, %c0_i32 : i32, i32
  }
  func.func @transform_2(%arg0: i32) -> (i32, i32) {
    %c0_i32 = arith.constant 0 : i32
    %c0_i32_0 = arith.constant 0 : i32
    %c0_i32_1 = arith.constant 0 : i32
    return %c0_i32, %c0_i32_0 : i32, i32
  }
  func.func @transform_3(%arg0: i32) -> (i32, i32) {
    %c0_i32 = arith.constant 0 : i32
    %c0_i32_0 = arith.constant 0 : i32
    %c0_i32_1 = arith.constant 0 : i32
    return %c0_i32, %c0_i32_0 : i32, i32
  }
  func.func @transform_4(%arg0: i32) -> (i32, i32) {
    %c0_i32 = arith.constant 0 : i32
    %c0_i32_0 = arith.constant 0 : i32
    %c0_i32_1 = arith.constant 0 : i32
    return %c0_i32, %c0_i32_0 : i32, i32
  }
  func.func @transform_5(%arg0: i32) -> (i32, i32) {
    %c0_i32 = arith.constant 0 : i32
    %c0_i32_0 = arith.constant 0 : i32
    %c0_i32_1 = arith.constant 0 : i32
    return %c0_i32, %c0_i32_0 : i32, i32
  }
  func.func @transform_6(%arg0: i32) -> (i32, i32) {
    %c0_i32 = arith.constant 0 : i32
    %c0_i32_0 = arith.constant 0 : i32
    return %arg0, %c0_i32 : i32, i32
  }
}

</mosaic_0001>

<bundles_post_ra>
// kernel: tpu_custom_call.1
= control target key start
LH: loop header
LB: loop body
LE: loop exit
PB: predicated region body
PF: predicated region fallthrough
CT: control target
= control target key end

     0   :  { %s1850_s0 = inlined_call_operand.hbm [shape: f32[16,128], index: 0, kind: input, shape index: {}]   ;;  %s1851_s1 = inlined_call_operand.hbm [shape: f32[16,128], index: 1, kind: input, shape index: {}]   ;;  %s1852_s2 = inlined_call_operand.hbm [shape: f32[128,384], index: 2, kind: input, shape index: {}]   ;;  %s1853_s3 = inlined_call_operand.hbm [shape: f32[128,256], index: 3, kind: input, shape index: {}]   ;;  %s1854_s4 = inlined_call_operand.hbm [shape: f32[128,128], index: 4, kind: input, shape index: {}]   ;;  %s1855_s5 = inlined_call_operand.vmem [shape: f32[1,384], index: 5, kind: input, shape index: {}]   ;;  %s1856_s6 = inlined_call_operand.hbm [shape: f32[16,128], index: 6, kind: output, shape index: {}]  }
   0x1   :  { %1861 = sst [smem:[#allocation17_spill]] %s1852_s2 }
   0x2   :  { %1862 = sst [smem:[#allocation18_spill]] %s1853_s3 }
   0x3   :  { %1863 = sst [smem:[#allocation19_spill]] %s1854_s4 }
   0x4   :  { %11 = vsyncpa [#allocation3], 0 }
   0x5   :  { %13 = vsyncpa [#allocation3 + $0x1], 0 }
   0x6   :  { %14 = vsyncpa [#allocation6], 0 }
   0x7   :  { %16 = vsyncpa [#allocation6 + $0x1], 0 }
   0x8   :  { %17 = vsyncpa [#allocation9], 0 }
   0x9   :  { %18 = vsyncpa [#allocation4], 0 }
   0xa   :  { %20 = vsyncpa [#allocation4 + $0x1], 0  ;;  %s1522_s21 = smov 0   ;;  %s1524_s22 = smov 0  }
   0xb   :  { %s1526_s23 = smov 0   ;;  %s1528_s24 = smov 0  }
   0xc LB: > { %s1543_s25 = sadd.s32 4294967295, %s1470_s24   ;;  %s901_s26 = sadd.s32 4294967294, %s1470_s24   ;;  %s1470_s24 = sphi %s1528_s24, %s1887_s24   ;;  %s1466_s23 = sphi %s1526_s23, %s1886_s23   ;;  %s1462_s22 = sphi %s1524_s22, %s1885_s22   ;;  %s1458_s21 = sphi %s1522_s21, %s1884_s21  }
   0xd   : > { %p46_p0 = scmp.ne.s32.totalorder %s1462_s22, %s1458_s21  ;;  %p1857_p1 = scmp.eq.s32.totalorder %s1543_s25, 0 }
   0xe   : > { %p186_p3 = scmp.eq.s32.totalorder %s901_s26, 1  ;;  %p902_p5 = scmp.ge.s32.totalorder %s1470_s24, 1 }
   0xf   : > { %p1552_p4 = por %p1857_p1, %p46_p0  ;;  %p193_p7 = scmp.lt.s32.totalorder %s1470_s24, 3 }
  0x10   : > { %p1557_p6 = por %p186_p3, %p46_p0  ;;  %s1472_s30 = smov [#allocation7]  }
  0x11   : > { %s1864_s27 = scalar_select %p1552_p4, 1, 0 }
  0x12   : > { %s1865_s28 = scalar_select %p1557_p6, 1, 0 }
  0x13   : > { %p1562_p8 = pnand %p902_p5, %p193_p7  ;;  %s205_s7 = sshll.u32 %s1472_s30, 4  ;;  %s1566_s7 = int_to_ptr.vmem [resolvable:$true] %s205_s7 }
  0x14   : > { %s1473_s9 = smov [#allocation8]   ;;  %s1868_s2 = sld [smem:[#allocation17_spill]] }
  0x15   : > { %s1866_s29 = scalar_select %p1562_p8, 1, 0 }
  0x16   : > { %p1165_p9 = pneg %p1562_p8  ;;  %s218_s10 = sshll.u32 %s1473_s9, 4  ;;  %s1577_s10 = int_to_ptr.vmem [resolvable:$true] %s218_s10 }
  0x18   : > { %p1573_p11 = pnand %p1165_p9, %p1857_p1 }
  0x1a   : > { %s1248_s13 = scalar_lea.hbm %s1868_s2, 6144  ;;  %p1587_p13 = pneg %p1573_p11 }
  0x1b   : > { %p1249_p12 = scmp.ne.s32.totalorder %s1868_s2, %s1248_s13  ;;  %p1255_p5 = scmp.lt.u32.totalorder %s1248_s13, %s1868_s2 }
  0x1d   : > { %p1251_p0 = pnand %p1587_p13, %p1249_p12 }
  0x1f   : > { %p1252_p3 = pneg %p1251_p0 }
  0x21   : > { %p1257_p7 = pnand %p1255_p5, %p1252_p3 }
  0x23   : > { %1260 = shalt.err (!%p1257_p7)
}
  0x24   : > { %s1261_s19 = scalar_lea.vmem %s1566_s7, 6144  ;;  %p1269_p2 = scmp.lt.s32.totalorder %s1566_s7, %s1566_s7 }
  0x25   : > { %p1262_p9 = scmp.ne.s32.totalorder %s1566_s7, %s1261_s19  ;;  %p1270_p6 = scmp.lt.s32.totalorder %s1261_s19, %s1261_s19 }
  0x27   : > { %p1264_p10 = pnand %p1262_p9, %p1587_p13  ;;  %p1271_p12 = por %p1270_p6, %p1269_p2 }
  0x29   : > { %p1265_p1 = pneg %p1264_p10 }
  0x2b   : > { %p1272_p0 = pnand %p1271_p12, %p1265_p1 }
  0x2d   : > { %1275 = shalt.err (!%p1272_p0)
}
  0x2e   : > { %s1474_s20 = smov 384   ;;  %s1475_s26 = smov 24  }
  0x2f   : > { %1168 = dma.hbm_to_vmem [thread:$0]  (!%p1573_p11), %s1868_s2, 6144, %s1566_s7, [#allocation6], %s1474_s20, %s1474_s20, %s1475_s26  }
  0x30   : > { %s1870_s3 = sld [smem:[#allocation18_spill]] }
  0x36   : > { %s1276_s13 = scalar_lea.hbm %s1870_s3, 4096 }
  0x37   : > { %p1277_p2 = scmp.ne.s32.totalorder %s1870_s3, %s1276_s13  ;;  %p1283_p10 = scmp.lt.u32.totalorder %s1276_s13, %s1870_s3 }
  0x39   : > { %p1279_p1 = pnand %p1277_p2, %p1587_p13 }
  0x3b   : > { %p1280_p6 = pneg %p1279_p1 }
  0x3d   : > { %p1285_p3 = pnand %p1283_p10, %p1280_p6 }
  0x3f   : > { %1288 = shalt.err (!%p1285_p3)
}
  0x40   : > { %s1289_s7 = scalar_lea.vmem %s1577_s10, 4096  ;;  %p1297_p12 = scmp.lt.s32.totalorder %s1577_s10, %s1577_s10 }
  0x41   : > { %p1290_p5 = scmp.ne.s32.totalorder %s1577_s10, %s1289_s7  ;;  %p1298_p0 = scmp.lt.s32.totalorder %s1289_s7, %s1289_s7 }
  0x43   : > { %p1292_p7 = pnand %p1290_p5, %p1587_p13  ;;  %p1299_p2 = por %p1298_p0, %p1297_p12 }
  0x45   : > { %p1293_p9 = pneg %p1292_p7 }
  0x47   : > { %p1300_p1 = pnand %p1299_p2, %p1293_p9 }
  0x49   : > { %1303 = shalt.err (!%p1300_p1)
}
  0x4a   : > { %s1476_s19 = smov 256   ;;  %s1477_s20 = smov 16  }
  0x4b   : > { %1171 = dma.hbm_to_vmem [thread:$0]  (!%p1573_p11), %s1870_s3, 4096, %s1577_s10, [#allocation9], %s1476_s19, %s1476_s19, %s1477_s20  }
  0x4c   : > { %s1478_s9 = smov [#allocation10]   ;;  %s1871_s4 = sld [smem:[#allocation19_spill]] }
  0x4d   : > { %s231_s11 = sshll.u32 %s1478_s9, 4  ;;  %s232_s11 = int_to_ptr.vmem [resolvable:$true] %s231_s11 }
  0x52   : > { %s1304_s14 = scalar_lea.hbm %s1871_s4, 2048 }
  0x53   : > { %p1305_p6 = scmp.ne.s32.totalorder %s1871_s4, %s1304_s14  ;;  %p1311_p5 = scmp.lt.u32.totalorder %s1304_s14, %s1871_s4 }
  0x55   : > { %p1307_p10 = pnand %p1305_p6, %p1587_p13 }
  0x57   : > { %p1308_p3 = pneg %p1307_p10 }
  0x59   : > { %p1313_p7 = pnand %p1311_p5, %p1308_p3 }
  0x5b   : > { %1316 = shalt.err (!%p1313_p7)
}
  0x5c   : > { %s1317_s10 = scalar_lea.vmem %s232_s11, 2048  ;;  %p1325_p2 = scmp.lt.s32.totalorder %s232_s11, %s232_s11 }
  0x5d   : > { %p1318_p9 = scmp.ne.s32.totalorder %s232_s11, %s1317_s10  ;;  %p1326_p1 = scmp.lt.s32.totalorder %s1317_s10, %s1317_s10 }
  0x5f   : > { %p1320_p12 = pnand %p1318_p9, %p1587_p13  ;;  %p1327_p4 = por %p1326_p1, %p1325_p2 }
  0x61   : > { %p1321_p0 = pneg %p1320_p12 }
  0x63   : > { %p1328_p8 = pnand %p1327_p4, %p1321_p0 }
  0x65   : > { %1331 = shalt.err (!%p1328_p8)
}
  0x66   : > { %s1479_s19 = smov 128   ;;  %s1480_s16 = smov 8  }
  0x67   : > { %1174 = dma.hbm_to_vmem [thread:$0]  (!%p1573_p11), %s1871_s4, 2048, %s232_s11, [#allocation9], %s1479_s19, %s1479_s19, %s1480_s16  }
  0x68   : > { %s1650_s30 = sadd.s32 1, %s1470_s24   ;;  %s33_s12 = sadd.s32 1, %s1466_s23 }
  0x69   : > { %s30_s9 = ssub.s32 %s1470_s24, %s1650_s30  ;;  %p40_p8 = scmp.ne.s32.totalorder %s1466_s23, %s1462_s22 }
  0x6a   : > { %p31_p4 = scmp.eq.s32.totalorder %s30_s9, 0  ;;  %p41_p13 = scmp.eq.s32.totalorder %s1470_s24, 0 }
  0x6b   : > { %p1189_p6 = scmp.lt.s32.totalorder %s1470_s24, 2  ;;  %p1872_p3 = scmp.eq.s32.totalorder %s1543_s25, 1 }
  0x6c   : > { %s1660_s13 = scalar_select %p31_p4, %s1466_s23, %s33_s12  }
  0x6d   : > { %p42_p10 = por %p41_p13, %p40_p8  ;;  %p1664_p5 = por %p1872_p3, %p40_p8 }
  0x6e   : > { %s248_s8 = sand.u32 1, %s1466_s23   ;;  %s908_s15 = sshll.u32 %s1470_s24, 7 }
  0x6f   : > { %s1873_s14 = scalar_select %p1664_p5, 1, 0 }
  0x70   : > { %s1670_s11 = sshll.u32 %s248_s8, 3  ;;  %s1675_s7 = scalar_lea.hbm %s1850_s0, %s908_s15 }
  0x71   : > { %s252_s10 = scalar_lea.vmem [#allocation2], %s1670_s11  ;;  %p1678_p11 = pnand %p1189_p6, %p42_p10 }
  0x72   : > { %s259_s19 = sshll.u32 %s252_s10, 4  ;;  %s1687_s9 = scalar_lea.hbm %s1851_s1, %s908_s15  ;;  %s1682_s19 = int_to_ptr.vmem [resolvable:$true] %s259_s19 }
  0x73   : > { %s249_s12 = scalar_lea.sflag [#allocation3], %s248_s8  ;;  %s1332_s17 = scalar_lea.hbm %s1675_s7, 128 }
  0x74   : > { %p1333_p7 = scmp.ne.s32.totalorder %s1675_s7, %s1332_s17  ;;  %p1334_p9 = pneg %p1678_p11 }
  0x75   : > { %s1337_s2 = scalar_lea.hbm %s1850_s0, 256  ;;  %p1338_p2 = scmp.lt.u32.totalorder %s1675_s7, %s1850_s0 }
  0x76   : > { %p1335_p12 = pnand %p1334_p9, %p1333_p7  ;;  %p1339_p1 = scmp.lt.u32.totalorder %s1337_s2, %s1332_s17 }
  0x77   : > { %p1341_p8 = scmp.lt.u32.totalorder %s1332_s17, %s1675_s7 }
  0x78   : > { %p1336_p0 = pneg %p1335_p12  ;;  %p1340_p4 = por %p1339_p1, %p1338_p2 }
  0x7a   : > { %p1342_p13 = por %p1341_p8, %p1340_p4 }
  0x7c   : > { %p1343_p6 = pnand %p1342_p13, %p1336_p0 }
  0x7e   : > { %1346 = shalt.err (!%p1343_p6)
}
  0x7f   : > { %s1347_s8 = scalar_lea.vmem %s1682_s19, 128  ;;  %s1481_s15 = smov [#allocation2]  }
  0x80   : > { %p1348_p10 = scmp.ne.s32.totalorder %s1682_s19, %s1347_s8  ;;  %s1352_s20 = sshll.u32 %s1481_s15, 4  ;;  %s1353_s20 = int_to_ptr.vmem [resolvable:$false] %s1352_s20 }
  0x81   : > { %s1354_s3 = scalar_lea.vmem %s1353_s20, 256  ;;  %p1355_p12 = scmp.lt.s32.totalorder %s1682_s19, %s1353_s20 }
  0x82   : > { %p1350_p3 = pnand %p1348_p10, %p1334_p9  ;;  %p1356_p2 = scmp.lt.s32.totalorder %s1354_s3, %s1347_s8 }
  0x84   : > { %p1351_p7 = pneg %p1350_p3  ;;  %p1357_p1 = por %p1356_p2, %p1355_p12 }
  0x86   : > { %p1358_p4 = pnand %p1357_p1, %p1351_p7 }
  0x88   : > { %1361 = shalt.err (!%p1358_p4)
}
  0x89   : > { %1178 = dma.hbm_to_vmem [thread:$0]  (!%p1678_p11), %s1675_s7, 128, %s1682_s19, %s249_s12  }
  0x8a   : > { %s266_s2 = sand.u32 1, %s1470_s24   ;;  %s270_s4 = scalar_lea.vmem [#allocation5], %s1670_s11 }
  0x8b   : > { %s277_s26 = sshll.u32 %s270_s4, 4  ;;  %s267_s17 = scalar_lea.sflag [#allocation6], %s266_s2  ;;  %s278_s26 = int_to_ptr.vmem [resolvable:$true] %s277_s26 }
  0x8c   : > { %s1362_s18 = scalar_lea.hbm %s1687_s9, 128  ;;  %s1367_s15 = scalar_lea.hbm %s1851_s1, 256 }
  0x8d   : > { %p1363_p0 = scmp.ne.s32.totalorder %s1687_s9, %s1362_s18  ;;  %p1368_p6 = scmp.lt.u32.totalorder %s1687_s9, %s1851_s1 }
  0x8e   : > { %p1369_p10 = scmp.lt.u32.totalorder %s1367_s15, %s1362_s18  ;;  %p1371_p7 = scmp.lt.u32.totalorder %s1362_s18, %s1687_s9 }
  0x8f   : > { %p1365_p8 = pnand %p1363_p0, %p1334_p9 }
  0x90   : > { %p1370_p3 = por %p1369_p10, %p1368_p6 }
  0x91   : > { %p1366_p13 = pneg %p1365_p8 }
  0x92   : > { %p1372_p12 = por %p1371_p7, %p1370_p3 }
  0x94   : > { %p1373_p2 = pnand %p1372_p12, %p1366_p13 }
  0x96   : > { %1376 = shalt.err (!%p1373_p2)
}
  0x97   : > { %s1377_s11 = scalar_lea.vmem %s278_s26, 128  ;;  %s1482_s7 = smov [#allocation5]  }
  0x98   : > { %p1378_p1 = scmp.ne.s32.totalorder %s278_s26, %s1377_s11  ;;  %s1382_s19 = sshll.u32 %s1482_s7, 4  ;;  %s1383_s19 = int_to_ptr.vmem [resolvable:$false] %s1382_s19 }
  0x99   : > { %s1384_s12 = scalar_lea.vmem %s1383_s19, 256  ;;  %p1385_p8 = scmp.lt.s32.totalorder %s278_s26, %s1383_s19 }
  0x9a   : > { %p1380_p4 = pnand %p1378_p1, %p1334_p9  ;;  %p1386_p5 = scmp.lt.s32.totalorder %s1384_s12, %s1377_s11 }
  0x9c   : > { %p1381_p0 = pneg %p1380_p4  ;;  %p1387_p6 = por %p1386_p5, %p1385_p8 }
  0x9e   : > { %p1388_p10 = pnand %p1387_p6, %p1381_p0 }
  0xa0   : > { %1391 = shalt.err (!%p1388_p10)
}
  0xa1   : > { %1181 = dma.hbm_to_vmem [thread:$0]  (!%p1678_p11), %s1687_s9, 128, %s278_s26, %s267_s17  }
  0xa2   : > { %p1875_p13 = scmp.ne.s32.totalorder %s1866_s29, 0 }
  0xa3   : > { %s1738_s2 = sand.u32 (!%p1875_p13), 1, %s1462_s22   ;;  %p1876_p5 = scmp.ne.s32.totalorder (!%p1875_p13), %s1864_s27, 0 }
  0xa4   : > { %286 = sbr.rel (%p1875_p13) target bundleno = 734 (0x2de), region = 44  ;;  %s1741_s4 = sshll.u32 (!%p1875_p13), %s1738_s2, 3 }
  0xa5   : > { %s289_s18 = scalar_lea.sflag (!%p1875_p13), [#allocation3], %s1738_s2  ;;  %s292_s10 = scalar_lea.vmem (!%p1875_p13), [#allocation2], %s1741_s4 }
  0xab   : > { %1437 = dma.done.wait (%p1876_p5), %s289_s18, 128  }
  0xac   : > { %1439 = vsyncadd (%p1876_p5), %s289_s18, 4294967168  ;;  %s297_s29 = sand.u32 1, %s1543_s25   ;;  %s301_s9 = scalar_lea.vmem [#allocation5], %s1741_s4 }
  0xad   : > { %s298_s16 = scalar_lea.sflag [#allocation6], %s297_s29 }
  0xae   : > { %1441 = dma.done.wait (%p1876_p5), %s298_s16, 128  }
  0xaf   : > { %1443 = vsyncadd (%p1876_p5), %s298_s16, 4294967168  ;;  %p1877_p11 = scmp.eq.s32.totalorder %s1543_s25, 0 }
  0xb1   : > { %1445 = dma.done.wait (%p1877_p11), [#allocation6], 6144   ;;  %p1878_p9 = pmov %p1877_p11 }
  0xb3   : > { %1447 = vsyncadd (%p1878_p9), [#allocation6], 4294961152  ;;  %p1879_p3 = pmov %p1878_p9 }
  0xb5   : > { %1449 = dma.done.wait (%p1879_p3), [#allocation9], 6144   ;;  %p1880_p7 = pmov %p1879_p3 }
  0xb6   : > { %v1483_v0 = vmov 0.0   ;;  %v1484_v1 = vmov 0.0|0.0   ;;  %vm1485_vm0 = vmmov 0   ;;  %v348_v2 = vld [vmem:[#allocation7 + $0x8] sm:$0xff]  ;;  %v351_v3 = vld [vmem:[#allocation7 + $0x20] sm:$0xff]  ;;  %v350_v6 = vld [vmem:[#allocation7 + $0x18] sm:$0xff] }
  0xb7   : > { %1451 = vsyncadd (%p1880_p7), [#allocation9], 4294961152  ;;  %526 = vmatprep.mubr.f32.mxu0 %v1483_v0  ;;  %1060 = vmatprep.subr.bf16.mxu1 %v1484_v1  ;;  %v347_v4 = vld [vmem:[#allocation7] sm:$0xff]  ;;  %v1028_v5 = vpack.c.bf16 %v351_v3, %v348_v2  ;;  %v354_v7 = vld [vmem:[#allocation7 + $0x38] sm:$0xff]  ;;  %s921_s17 = sshll.u32 %s1543_s25, 7  ;;  %s346_s8 = scalar_lea.vmem [#allocation11], %s1741_s4 }
  0xb8   : > { %990 = vmatprep.mubr.msk.f32.mxu1 %vm1485_vm0, %v1483_v0  ;;  %v357_v8 = vld [vmem:[#allocation7 + $0x50] sm:$0xff]  ;;  %v1030_v9 = vpack.c.bf16 %v350_v6, %v347_v4  ;;  %v356_v12 = vld [vmem:[#allocation7 + $0x48] sm:$0xff]  ;;  %v363_v14 = vld [vmem:[#allocation7 + $0x80] sm:$0xff]  ;;  %s780_s15 = sshll.u32 %s346_s8, 4  ;;  %s1806_s11 = scalar_lea.hbm %s1856_s6, %s921_s17  ;;  %s1808_s15 = int_to_ptr.vmem [resolvable:$true] %s780_s15 }
  0xb9   : > { %v1032_v10 = vpack.c.bf16 %v357_v8, %v354_v7  ;;  %v353_v11 = vld [vmem:[#allocation7 + $0x30] sm:$0xff]  ;;  %v360_v13 = vld [vmem:[#allocation7 + $0x68] sm:$0xff]  ;;  %1029 = vmatprep.subr.bf16.mxu0 %v1028_v5  ;;  %v359_v17 = vld [vmem:[#allocation7 + $0x60] sm:$0xff]  ;;  %s767_s7 = scalar_lea.sflag [#allocation4], %s1738_s2  ;;  %s1392_s19 = scalar_lea.vmem %s1808_s15, 128 }
  0xba   : > { %1031 = vmatpush1.bf16.msra.mxu0 %v1030_v9  ;;  %v1034_v15 = vpack.c.bf16 %v356_v12, %v353_v11  ;;  %v1036_v16 = vpack.c.bf16 %v363_v14, %v360_v13  ;;  %v362_v18 = vld [vmem:[#allocation7 + $0x78] sm:$0xff]  ;;  %v369_v20 = vld [vmem:[#allocation7 + $0xb0] sm:$0xff]  ;;  %v368_v24 = vld [vmem:[#allocation7 + $0xa8] sm:$0xff]  ;;  %p1393_p12 = scmp.ne.s32.totalorder %s1808_s15, %s1392_s19  ;;  %p1881_p2 = scmp.ne.s32.totalorder %s1873_s14, 0 }
  0xbb   : > { %1033 = vmatprep.subr.bf16.mxu0 %v1032_v10  ;;  %v366_v19 = vld [vmem:[#allocation7 + $0x98] sm:$0xff]  ;;  %v1038_v21 = vpack.c.bf16 %v362_v18, %v359_v17  ;;  %v365_v23 = vld [vmem:[#allocation7 + $0x90] sm:$0xff]  ;;  %v372_v25 = vld [vmem:[#allocation7 + $0xc8] sm:$0xff]  ;;  %s1486_s25 = smov [#allocation11]  }
  0xbc   : > { %v1040_v22 = vpack.c.bf16 %v369_v20, %v366_v19  ;;  %v375_v26 = vld [vmem:[#allocation7 + $0xe0] sm:$0xff]  ;;  %v1042_v27 = vpack.c.bf16 %v368_v24, %v365_v23  ;;  %v374_v30 = vld [vmem:[#allocation7 + $0xd8] sm:$0xff]  ;;  %v381_v32 = vld [vmem:[#allocation7 + $0x110] sm:$0xff]  ;;  %p1394_p1 = pnand %p1393_p12, %p1881_p2  ;;  %s1396_s12 = sshll.u32 %s1486_s25, 4  ;;  %s1397_s12 = int_to_ptr.vmem [resolvable:$false] %s1396_s12 }
  0xbd   : > { %v1044_v28 = vpack.c.bf16 %v375_v26, %v372_v25  ;;  %v371_v29 = vld [vmem:[#allocation7 + $0xc0] sm:$0xff]  ;;  %v378_v31 = vld [vmem:[#allocation7 + $0xf8] sm:$0xff]  ;;  %v377_v35 = vld [vmem:[#allocation7 + $0xf0] sm:$0xff]  ;;  %s1398_s4 = scalar_lea.vmem %s1397_s12, 256  ;;  %p1399_p0 = scmp.lt.s32.totalorder %s1808_s15, %s1397_s12 }
  0xbe   : > { %1035 = vmatpush1.bf16.msra.mxu0 %v1034_v15  ;;  %v1046_v33 = vpack.c.bf16 %v374_v30, %v371_v29  ;;  %v1048_v34 = vpack.c.bf16 %v381_v32, %v378_v31  ;;  %v380_v36 = vld [vmem:[#allocation7 + $0x108] sm:$0xff]  ;;  %v387_v38 = vld [vmem:[#allocation7 + $0x140] sm:$0xff]  ;;  %v386_v42 = vld [vmem:[#allocation7 + $0x138] sm:$0xff]  ;;  %p1395_p4 = pneg %p1394_p1  ;;  %p1400_p8 = scmp.lt.s32.totalorder %s1398_s4, %s1392_s19 }
  0xbf   : > { %1037 = vmatprep.subr.bf16.mxu0 %v1036_v16  ;;  %v384_v37 = vld [vmem:[#allocation7 + $0x128] sm:$0xff]  ;;  %v1050_v39 = vpack.c.bf16 %v380_v36, %v377_v35  ;;  %v383_v40 = vld [vmem:[#allocation7 + $0x120] sm:$0xff]  ;;  %v390_v43 = vld [vmem:[#allocation7 + $0x158] sm:$0xff] }
  0xc0   : > { %v1052_v41 = vpack.c.bf16 %v387_v38, %v384_v37  ;;  %v393_v44 = vld [vmem:[#allocation7 + $0x170] sm:$0xff]  ;;  %v352_v46 = vld [vmem:[#allocation7 + $0x28] sm:$0xff]  ;;  %v355_v47 = vld [vmem:[#allocation7 + $0x40] sm:$0xff]  ;;  %v1054_v50 = vpack.c.bf16 %v386_v42, %v383_v40  ;;  %p1401_p6 = por %p1400_p8, %p1399_p0 }
  0xc1   : > { %v349_v45 = vld [vmem:[#allocation7 + $0x10] sm:$0xff]  ;;  %v358_v49 = vld [vmem:[#allocation7 + $0x58] sm:$0xff]  ;;  %v1056_v51 = vpack.c.bf16 %v393_v44, %v390_v43  ;;  %v392_v53 = vld [vmem:[#allocation7 + $0x168] sm:$0xff] }
  0xc2   : > { %1039 = vmatpush1.bf16.msra.mxu0 %v1038_v21  ;;  %v1061_v48 = vpack.c.bf16 %v352_v46, %v349_v45  ;;  %v389_v52 = vld [vmem:[#allocation7 + $0x150] sm:$0xff]  ;;  %v396_v54 = vld [vmem:[#allocation8 + $0x8] sm:$0xff]  ;;  %v1064_v55 = vpack.c.bf16 %v358_v49, %v355_v47  ;;  %v398_v56 = vld [vmem:[#allocation8 + $0x18] sm:$0xff]  ;;  %p1402_p10 = pnand %p1401_p6, %p1395_p4 }
  0xc3   : > { %1041 = vmatprep.subr.bf16.mxu0 %v1040_v22  ;;  %v361_v57 = vld [vmem:[#allocation7 + $0x70] sm:$0xff]  ;;  %v364_v58 = vld [vmem:[#allocation7 + $0x88] sm:$0xff]  ;;  %v1058_v59 = vpack.c.bf16 %v392_v53, %v389_v52  ;;  %v1084_v60 = vpack.c.bf16 %v398_v56, %v396_v54  ;;  %v395_v61 = vld [vmem:[#allocation8] sm:$0xff] }
  0xc4   : > { %1062 = vmatpush3.bf16.msra.mxu1 %v1061_v48  ;;  %v397_v62 = vld [vmem:[#allocation8 + $0x10] sm:$0xff]  ;;  %v400_v63 = vld [vmem:[#allocation8 + $0x28] sm:$0xff]  ;;  %v1067_v2 = vpack.c.bf16 %v364_v58, %v361_v57  ;;  %v402_v3 = vld [vmem:[#allocation8 + $0x38] sm:$0xff] }
  0xc5   : > { %1063 = vmatprep.subr.bf16.mxu1 %v1484_v1  ;;  %v367_v4 = vld [vmem:[#allocation7 + $0xa0] sm:$0xff]  ;;  %v370_v5 = vld [vmem:[#allocation7 + $0xb8] sm:$0xff]  ;;  %v1086_v7 = vpack.c.bf16 %v397_v62, %v395_v61  ;;  %v1088_v8 = vpack.c.bf16 %v402_v3, %v400_v63  ;;  %v401_v10 = vld [vmem:[#allocation8 + $0x30] sm:$0xff] }
  0xc6   : > { %1043 = vmatpush1.bf16.msra.mxu0 %v1042_v27  ;;  %v1771_v6 = vld [vmem:[%s301_s9] sm:$0xff]  ;;  %v399_v9 = vld [vmem:[#allocation8 + $0x20] sm:$0xff]  ;;  %v404_v11 = vld [vmem:[#allocation8 + $0x48] sm:$0xff]  ;;  %v1070_v12 = vpack.c.bf16 %v370_v5, %v367_v4 }
  0xc7   : > { %1045 = vmatprep.subr.bf16.mxu0 %v1044_v28  ;;  %v406_v13 = vld [vmem:[#allocation8 + $0x58] sm:$0xff]  ;;  %v373_v14 = vld [vmem:[#allocation7 + $0xd0] sm:$0xff]  ;;  %v376_v15 = vld [vmem:[#allocation7 + $0xe8] sm:$0xff]  ;;  %v1090_v16 = vpack.c.bf16 %v401_v10, %v399_v9 }
  0xc8   : > { %1065 = vmatpush3.bf16.msra.mxu1 %v1064_v55  ;;  %v1092_v17 = vpack.c.bf16 %v406_v13, %v404_v11  ;;  %v403_v18 = vld [vmem:[#allocation8 + $0x40] sm:$0xff]  ;;  %v405_v19 = vld [vmem:[#allocation8 + $0x50] sm:$0xff]  ;;  %v408_v20 = vld [vmem:[#allocation8 + $0x68] sm:$0xff]  ;;  %v1073_v21 = vpack.c.bf16 %v376_v15, %v373_v14 }
  0xc9   : > { %1066 = vmatprep.subr.bf16.mxu1 %v1484_v1  ;;  %v410_v22 = vld [vmem:[#allocation8 + $0x78] sm:$0xff]  ;;  %v379_v23 = vld [vmem:[#allocation7 + $0x100] sm:$0xff]  ;;  %v1094_v25 = vpack.c.bf16 %v405_v19, %v403_v18  ;;  %v409_v28 = vld [vmem:[#allocation8 + $0x70] sm:$0xff] }
  0xca   : > { %1047 = vmatpush1.bf16.msra.mxu0 %v1046_v33  ;;  %v382_v24 = vld [vmem:[#allocation7 + $0x118] sm:$0xff]  ;;  %v1096_v26 = vpack.c.bf16 %v410_v22, %v408_v20  ;;  %v407_v27 = vld [vmem:[#allocation8 + $0x60] sm:$0xff]  ;;  %v412_v29 = vld [vmem:[#allocation8 + $0x88] sm:$0xff] }
  0xcb   : > { %1049 = vmatprep.subr.bf16.mxu0 %v1048_v34  ;;  %v1076_v30 = vpack.c.bf16 %v382_v24, %v379_v23  ;;  %v414_v31 = vld [vmem:[#allocation8 + $0x98] sm:$0xff]  ;;  %v385_v32 = vld [vmem:[#allocation7 + $0x130] sm:$0xff]  ;;  %v388_v33 = vld [vmem:[#allocation7 + $0x148] sm:$0xff]  ;;  %v1098_v34 = vpack.c.bf16 %v409_v28, %v407_v27  ;;  %v447_v23 = vlaneseq }
  0xcc   : > { %1068 = vmatpush3.bf16.msra.mxu1 %v1067_v2  ;;  %v1100_v35 = vpack.c.bf16 %v414_v31, %v412_v29  ;;  %v411_v36 = vld [vmem:[#allocation8 + $0x80] sm:$0xff]  ;;  %v413_v37 = vld [vmem:[#allocation8 + $0x90] sm:$0xff]  ;;  %v416_v38 = vld [vmem:[#allocation8 + $0xa8] sm:$0xff] }
  0xcd   : > { %1069 = vmatprep.subr.bf16.mxu1 %v1484_v1  ;;  %v418_v40 = vld [vmem:[#allocation8 + $0xb8] sm:$0xff]  ;;  %v1102_v43 = vpack.c.bf16 %v413_v37, %v411_v36  ;;  %v415_v45 = vld [vmem:[#allocation8 + $0xa0] sm:$0xff]  ;;  %v417_v46 = vld [vmem:[#allocation8 + $0xb0] sm:$0xff]  ;;  %v448_v24 = vshrl.u32 %v447_v23, 7 }
  0xce   : > { %1051 = vmatpush1.bf16.msra.mxu0 %v1050_v39  ;;  %v1079_v39 = vpack.c.bf16 %v388_v33, %v385_v32  ;;  %v394_v42 = vld [vmem:[#allocation7 + $0x178] sm:$0xff]  ;;  %v1104_v44 = vpack.c.bf16 %v418_v40, %v416_v38  ;;  %v420_v48 = vld [vmem:[#allocation8 + $0xc8] sm:$0xff]  ;;  %v419_v52 = vld [vmem:[#allocation8 + $0xc0] sm:$0xff] }
  0xcf   : > { %1053 = vmatprep.subr.bf16.mxu0 %v1052_v41  ;;  %v391_v41 = vld [vmem:[#allocation7 + $0x160] sm:$0xff]  ;;  %v422_v49 = vld [vmem:[#allocation8 + $0xd8] sm:$0xff]  ;;  %v421_v53 = vld [vmem:[#allocation8 + $0xd0] sm:$0xff] }
  0xd0   : > { %1071 = vmatpush3.bf16.msra.mxu1 %v1070_v12  ;;  %v1082_v47 = vpack.c.bf16 %v394_v42, %v391_v41  ;;  %v424_v54 = vld [vmem:[#allocation8 + $0xe8] sm:$0xff]  ;;  %v426_v55 = vld [vmem:[#allocation8 + $0xf8] sm:$0xff]  ;;  %v1110_v56 = vpack.c.bf16 %v421_v53, %v419_v52  ;;  %v423_v58 = vld [vmem:[#allocation8 + $0xe0] sm:$0xff]  ;;  %v457_v41 = vsub.s32 2, %v448_v24 }
  0xd1   : > { %1072 = vmatprep.subr.bf16.mxu1 %v1484_v1  ;;  %v1112_v57 = vpack.c.bf16 %v426_v55, %v424_v54  ;;  %v1786_v61 = vld [vmem:[%s292_s10] sm:$0xff]  ;;  %v429_v3 = vld [vmem:[#allocation10 + $0x10] sm:$0xff]  ;;  %v430_v4 = vld [vmem:[#allocation10 + $0x18] sm:$0xff] }
  0xd2   : > { %1055 = vmatpush1.bf16.msra.mxu0 %v1054_v50  ;;  %v1106_v50 = vpack.c.bf16 %v417_v46, %v415_v45  ;;  %v427_v62 = vld [vmem:[#allocation10] sm:$0xff]  ;;  %v428_v63 = vld [vmem:[#allocation10 + $0x8] sm:$0xff]  ;;  %v1120_v5 = vpack.c.bf16 %v430_v4, %v429_v3  ;;  %v434_v9 = vld [vmem:[#allocation10 + $0x38] sm:$0xff] }
  0xd3   : > { %1057 = vmatprep.subr.bf16.mxu0 %v1056_v51  ;;  %v1108_v51 = vpack.c.bf16 %v422_v49, %v420_v48  ;;  %v1117_v2 = vpack.c.bf16 %v428_v63, %v427_v62  ;;  %v435_v11 = vld [vmem:[#allocation10 + $0x40] sm:$0xff]  ;;  %v436_v12 = vld [vmem:[#allocation10 + $0x48] sm:$0xff]  ;;  %v437_v14 = vld [vmem:[#allocation10 + $0x50] sm:$0xff] }
  0xd4   : > { %1074 = vmatpush3.bf16.msra.mxu1 %v1073_v21  ;;  %v1129_v13 = vpack.c.bf16 %v436_v12, %v435_v11  ;;  %v438_v15 = vld [vmem:[#allocation10 + $0x58] sm:$0xff]  ;;  %v440_v18 = vld [vmem:[#allocation10 + $0x68] sm:$0xff]  ;;  %v441_v20 = vld [vmem:[#allocation10 + $0x70] sm:$0xff] }
  0xd5   : > { %1075 = vmatprep.subr.bf16.mxu1 %v1484_v1  ;;  %v442_v21 = vld [vmem:[#allocation10 + $0x78] sm:$0xff] }
  0xd6   : > { %1059 = vmatpush1.bf16.msra.mxu0 %v1058_v59  ;;  %v425_v59 = vld [vmem:[#allocation8 + $0xf0] sm:$0xff]  ;;  %v1138_v22 = vpack.c.bf16 %v442_v21, %v441_v20 }
  0xd7   : > { %1085 = vmatprep.subr.bf16.mxu0 %v1084_v60  ;;  %v1114_v60 = vpack.c.bf16 %v425_v59, %v423_v58 }
  0xd8   : > { %1077 = vmatpush3.bf16.msra.mxu1 %v1076_v30 }
  0xd9   : > { %527 = vmatmul.mubr.f32.vlgmr.msra.gmra.mrb[0].mxu0 %v1771_v6  ;;  %1078 = vmatprep.subr.bf16.mxu1 %v1484_v1 }
  0xda   : > { %1087 = vmatpush1.bf16.msra.mxu0 %v1086_v7  ;;  %667 = vmatprep.mubr.f32.mxu0 %v1483_v0 }
  0xdb   : > { %1089 = vmatprep.subr.bf16.mxu0 %v1088_v8  ;;  %v433_v8 = vld [vmem:[#allocation10 + $0x30] sm:$0xff] }
  0xdc   : > { %1080 = vmatpush3.bf16.msra.mxu1 %v1079_v39  ;;  %v1126_v10 = vpack.c.bf16 %v434_v9, %v433_v8 }
  0xdd   : > { %1081 = vmatprep.subr.bf16.mxu1 %v1484_v1 }
  0xde   : > { %1091 = vmatpush1.bf16.msra.mxu0 %v1090_v16  ;;  %v1132_v16 = vpack.c.bf16 %v438_v15, %v437_v14 }
  0xdf   : > { %1093 = vmatprep.subr.bf16.mxu0 %v1092_v17  ;;  %v439_v17 = vld [vmem:[#allocation10 + $0x60] sm:$0xff] }
  0xe0   : > { %1083 = vmatpush3.bf16.msra.mxu1 %v1082_v47  ;;  %v1135_v19 = vpack.c.bf16 %v440_v18, %v439_v17 }
  0xe1   : > { %1116 = vmatprep.subr.bf16.mxu1 %v1484_v1 }
  0xe2   : > { %1095 = vmatpush1.bf16.msra.mxu0 %v1094_v25  ;;  %v449_v25 = vsub.s32 0, %v448_v24 }
  0xe3   : > { %1097 = vmatprep.subr.bf16.mxu0 %v1096_v26  ;;  %991 = vmatmul.mubr.f32.vlgmr.msra.gmra.mrb[0].mxu1 %v1771_v6  ;;  %v432_v6 = vld [vmem:[#allocation10 + $0x28] sm:$0xff]  ;;  %v443_v26 = vld [vmem:[%s1855_s5] sm:$0x7] }
  0xe4   : > { %1025 = vmatprep.mubr.msk.f32.mxu1 %vm1485_vm0, %v1483_v0  ;;  %1118 = vmatpush3.bf16.msra.mxu1 %v1117_v2  ;;  %v431_v0 = vld [vmem:[#allocation10 + $0x20] sm:$0xff]  ;;  %v450_v27 = vrot.slane %v443_v26, %v449_v25  ;;  %v458_v42 = vrot.slane %v443_v26, %v457_v41 }
  0xe5   : > { %1119 = vmatprep.subr.bf16.mxu1 %v1484_v1  ;;  %v1123_v7 = vpack.c.bf16 %v432_v6, %v431_v0 }
  0xe6   : > { %1099 = vmatpush1.bf16.msra.mxu0 %v1098_v34 }
  0xe7   : > { %1101 = vmatprep.subr.bf16.mxu0 %v1100_v35  ;;  %v453_v35 = vsub.s32 1, %v448_v24 }
  0xe8   : > { %1121 = vmatpush3.bf16.msra.mxu1 %v1120_v5 }
  0xe9   : > { %1122 = vmatprep.subr.bf16.mxu1 %v1484_v1  ;;  %v454_v36 = vrot.slane %v443_v26, %v453_v35 }
  0xea   : > { %1103 = vmatpush1.bf16.msra.mxu0 %v1102_v43 }
  0xeb   : > { %1105 = vmatprep.subr.bf16.mxu0 %v1104_v44 }
  0xec   : > { %1124 = vmatpush3.bf16.msra.mxu1 %v1123_v7 }
  0xed   : > { %1125 = vmatprep.subr.bf16.mxu1 %v1484_v1 }
  0xee   : > { %1107 = vmatpush1.bf16.msra.mxu0 %v1106_v50 }
  0xef   : > { %1109 = vmatprep.subr.bf16.mxu0 %v1108_v51 }
  0xf0   : > { %1127 = vmatpush3.bf16.msra.mxu1 %v1126_v10 }
  0xf1   : > { %1128 = vmatprep.subr.bf16.mxu1 %v1484_v1 }
  0xf2   : > { %1111 = vmatpush1.bf16.msra.mxu0 %v1110_v56 }
  0xf3   : > { %1113 = vmatprep.subr.bf16.mxu0 %v1112_v57 }
  0xf4   : > { %1130 = vmatpush3.bf16.msra.mxu1 %v1129_v13 }
  0xf5   : > { %1131 = vmatprep.subr.bf16.mxu1 %v1484_v1 }
  0xf6   : > { %1115 = vmatpush1.bf16.msra.mxu0 %v1114_v60 }
  0xf8   : > { %1133 = vmatpush3.bf16.msra.mxu1 %v1132_v16 }
  0xf9   : > { %668 = vmatmul.mubr.f32.vlgmr.msra.gmra.mrb[0].mxu0 %v1786_v61  ;;  %1134 = vmatprep.subr.bf16.mxu1 %v1484_v1 }
  0xfc   : > { %1136 = vmatpush3.bf16.msra.mxu1 %v1135_v19 }
  0xfd   : > { %1137 = vmatprep.subr.bf16.mxu1 %v1484_v1 }
 0x100   : > { %1139 = vmatpush3.bf16.msra.mxu1 %v1138_v22 }
 0x1cc   : > { %v669_v28 = vpop.f32.mrb[0].mxu0 }
 0x1cd   : > { %v1140_v29 = vadd.f32 %v669_v28, %v450_v27  ;;  %v671_v30 = vpop.f32.mrb[1].mxu0 }
 0x1ce   : > { %v1141_v37 = vadd.f32 %v671_v30, %v454_v36 }
 0x1cf   : > { %v918_v31 = vmul.f32 -1.442695, %v1140_v29 }
 0x1d0   : > { %v919_v38 = vmul.f32 -1.442695, %v1141_v37 }
 0x1d1   : > { %1238 = vpow2.f32 %v918_v31 }
 0x1db   : > { %v1239_v32 = vpop.eup %1238 }
 0x1dc   : > { %v678_v33 = vadd.f32 1.0, %v1239_v32 }
 0x1de   : > { %1240 = vrcp.f32 %v678_v33 }
 0x1df   : > { %1242 = vpow2.f32 %v919_v38 }
 0x1e8   : > { %v1241_v34 = vpop.eup %1240 }
 0x1e9   : > { %v688_v1 = vmul.f32 %v1241_v34, %v1786_v61  ;;  %v1243_v39 = vpop.eup %1242 }
 0x1ea   : > { %v685_v40 = vadd.f32 1.0, %v1243_v39 }
 0x1eb   : > { %1026 = vmatmul.mubr.f32.vlgmr.msra.gmra.mrb[0].mxu1 %v688_v1 }
 0x1ec   : > { %1244 = vrcp.f32 %v685_v40 }
 0x1f6   : > { %v1245_v46 = vpop.eup %1244 }
 0x1f7   : > { %v761_v47 = vsub.f32 1.0, %v1245_v46 }
 0x1f9   : > { %v762_v50 = vmul.f32 %v761_v47, %v1786_v61 }
 0x2be   : > { %v755_v43 = vpop.f32.mrb[0].mxu1 }
 0x2bf   : > { %v1142_v44 = vadd.f32 %v755_v43, %v458_v42  ;;  %v1027_v45 = vpop.f32.mrb[1].mxu1 }
 0x2c1   : > { %1246 = vtanh.f32 %v1142_v44 }
 0x2cb   : > { %v1247_v48 = vpop.eup %1246 }
 0x2cc   : > { %v763_v49 = vmul.f32 %v1247_v48, %v1245_v46 }
 0x2ce   : > { %v764_v51 = vadd.f32 %v763_v49, %v762_v50 }
 0x2d0   : > { %765 = vst [vmem:[%s346_s8] sm:$0xff] %v764_v51 }
 0x2d1   : > { %1405 = shalt.err (!%p1402_p10)
}
 0x2d2   : > { %s1406_s2 = scalar_lea.hbm %s1806_s11, 128  ;;  %s1410_s29 = scalar_lea.hbm %s1856_s6, 256 }
 0x2d3   : > { %p1407_p13 = scmp.ne.s32.totalorder %s1806_s11, %s1406_s2  ;;  %p1411_p9 = scmp.lt.u32.totalorder %s1806_s11, %s1856_s6 }
 0x2d4   : > { %p1412_p3 = scmp.lt.u32.totalorder %s1410_s29, %s1406_s2  ;;  %p1414_p12 = scmp.lt.u32.totalorder %s1406_s2, %s1806_s11 }
 0x2d5   : > { %p1408_p5 = pnand %p1407_p13, %p1881_p2 }
 0x2d6   : > { %p1413_p7 = por %p1412_p3, %p1411_p9 }
 0x2d7   : > { %p1409_p11 = pneg %p1408_p5 }
 0x2d8   : > { %p1415_p1 = por %p1414_p12, %p1413_p7 }
 0x2da   : > { %p1416_p4 = pnand %p1415_p1, %p1409_p11 }
 0x2dc   : > { %1419 = shalt.err (!%p1416_p4)
}
 0x2dd   : > { %1163 = dma.vmem_to_hbm [thread:$0]  (%p1881_p2), %s1808_s15, 128, %s1806_s11, %s767_s7  }
 0x2de PF: > { %s792_s27 = sand.u32 1, %s1458_s21   ;;  %p1882_p0 = scmp.ne.s32.totalorder %s1865_s28, 0 }
 0x2df   : > { %p1883_p8 = scmp.ge.s32.totalorder %s1470_s24, 2  ;;  %s793_s26 = scalar_lea.sflag [#allocation4], %s792_s27 }
 0x2e1   : > { %p1183_p6 = pnand %p1883_p8, %p1882_p0 }
 0x2e3   : > { %1453 = dma.done.wait (!%p1183_p6), %s793_s26, 128  }
 0x2e4   : > { %1455 = vsyncadd (!%p1183_p6), %s793_s26, 4294967168  ;;  %p23_p10 = scmp.ge.s32.totalorder %s1650_s30, 4   ;;  %s1884_s21 = smov %s1462_s22 }
 0x2e5   : > { %s1885_s22 = smov %s1466_s23  ;;  %s1886_s23 = smov %s1660_s13 }
 0x2e6   : > { %s1887_s24 = smov %s1650_s30  ;;  %25 = sbr.rel (!%p23_p10) target bundleno = 12 (0xc), region = 114 }
 0x2ed   :  { %798 = vsyncpa [#allocation3], 1 }
 0x2ee   :  { %800 = vsyncpa [#allocation3 + $0x1], 1 }
 0x2ef   :  { %801 = vsyncpa [#allocation6], 1 }
 0x2f0   :  { %803 = vsyncpa [#allocation6 + $0x1], 1 }
 0x2f1   :  { %804 = vsyncpa [#allocation9], 1 }
 0x2f2   :  { %805 = vsyncpa [#allocation4], 1 }
 0x2f3   :  { %807 = vsyncpa [#allocation4 + $0x1], 1 }

</bundles_post_ra>
